<compile_context>
chip_gen: v7x
topology: tpu7x:2x2x1
jax: 0.10.0
libtpu: 0.0.40
codegen_flags: <defaults>
</compile_context>

<pallas_src>
import jax
import jax.numpy as jnp
from jax.experimental import pallas as pl
from jax.experimental.pallas import tpu as pltpu


def _round_up(n, m):
    return ((n + m - 1) // m) * m


def _softplus(x):
    # Numerically-stable softplus matching F.softplus defaults (beta=1, threshold=20).
    return jnp.where(x > 20.0, x, jnp.log1p(jnp.exp(jnp.minimum(x, 20.0))))


def w_mlp_kernel(xt_ref, w1t_ref, b1_ref, w2t_ref, b2_ref, w3_ref, b3_ref, o_ref):
    # Everything in here is (features, TM): batch on the lane axis.
    w1t = w1t_ref[...]                                  # (H, S)  matmul dtype
    w2t = w2t_ref[...]                                  # (H, H)
    w3 = w3_ref[...]                                    # (1, H)
    xt = xt_ref[...].astype(w1t.dtype)                  # (S, TM)

    h1 = jnp.dot(w1t, xt, preferred_element_type=jnp.float32) + b1_ref[...]        # (H, TM)
    h1 = jnp.maximum(h1, 0.0)                                                       # relu(fc1)
    h2 = jnp.dot(w2t, h1.astype(w2t.dtype), preferred_element_type=jnp.float32) + b2_ref[...]
    h2 = jnp.maximum(h2, 0.0)                                                       # relu(fc2)
    # fc3: single-sublane MXU pass -> lane-dense (1, TM) row.
    h3 = jnp.dot(w3, h2.astype(w3.dtype), preferred_element_type=jnp.float32) + b3_ref[...]
    o_ref[...] = _softplus(h3)                                                      # softplus(fc3)


def w_forward(x, params, *, block_m=4096, matmul_dtype=jnp.bfloat16):
    w1, b1, w2, b2, w3, b3 = params
    B, S = x.shape
    H = w1.shape[1]

    # Pre-transposed / pre-cast weights so the kernel's batch axis is the lane axis.
    w1t = w1.T.astype(matmul_dtype)                      # (H, S)
    w2t = w2.T.astype(matmul_dtype)                      # (H, H)
    w3r = w3.reshape(1, H).astype(matmul_dtype)          # (1, H)
    b1c = b1.reshape(H, 1).astype(jnp.float32)           # (H, 1) broadcasts over lanes
    b2c = b2.reshape(H, 1).astype(jnp.float32)
    b3c = b3.reshape(1, 1).astype(jnp.float32)

    # Batch tile: lane-aligned (multiple of 128). Keep >=2 grid steps when the
    # batch is big enough so "parallel" can use both TensorCores on v7x.
    b128 = _round_up(B, 128)
    tm = min(block_m, b128)
    if tm == b128 and b128 >= 256:
        tm = _round_up(b128 // 2, 128)
    b_pad = _round_up(B, tm)

    xt = jnp.pad(x.T.astype(jnp.float32), ((0, 0), (0, b_pad - B)))   # (S, b_pad)

    grid = (b_pad // tm,)
    pinned = lambda i: (0, 0)   # same block every step -> weights stay VMEM-resident

    w_itemsize = jnp.dtype(matmul_dtype).itemsize
    vmem_bytes = (
        2 * (S * tm + tm) * 4                                          # x/out double buffers
        + 2 * ((H * S + H * H + H) * w_itemsize + (2 * H + 1) * 4)     # pinned params
        + 4 * H * tm * 4                                               # h1/h2 temporaries
        + (2 << 20)                                                    # headroom
    )
    vmem_limit = max(int(vmem_bytes), 8 * 1024 * 1024)

    out = pl.pallas_call(
        w_mlp_kernel,
        out_shape=jax.ShapeDtypeStruct((1, b_pad), jnp.float32),
        grid=grid,
        in_specs=[
            pl.BlockSpec((S, tm), lambda i: (0, i)),     # xᵀ tiled over batch lanes
            pl.BlockSpec(w1t.shape, pinned),
            pl.BlockSpec(b1c.shape, pinned),
            pl.BlockSpec(w2t.shape, pinned),
            pl.BlockSpec(b2c.shape, pinned),
            pl.BlockSpec(w3r.shape, pinned),
            pl.BlockSpec(b3c.shape, pinned),
        ],
        out_specs=pl.BlockSpec((1, tm), lambda i: (0, i)),  # lane-dense output row
        compiler_params=pltpu.CompilerParams(
            dimension_semantics=("parallel",),           # megacore sharding on v7x
            vmem_limit_bytes=vmem_limit,
        ),
        cost_estimate=pl.CostEstimate(
            flops=int(2 * b_pad * (S * H + H * H + H)),
            transcendentals=int(2 * b_pad),              # exp + log1p per row
            bytes_accessed=int(4 * (b_pad * S + b_pad)
                               + (H * S + H * H + H) * w_itemsize
                               + (2 * H + 1) * 4),
        ),
    )(xt, w1t, b1c, w2t, b2c, w3r, b3c)

    return out[0, :B].reshape(B, 1)


def init_params(key, num_state, num_hidden):
    # Deterministic init mimicking nn.Linear's uniform(-1/sqrt(fan_in), 1/sqrt(fan_in)).
    ks = jax.random.split(key, 6)

    def lin(kw, kb, fan_in, fan_out):
        bound = 1.0 / jnp.sqrt(fan_in)
        w = jax.random.uniform(kw, (fan_in, fan_out), jnp.float32, -bound, bound)
        b = jax.random.uniform(kb, (1, fan_out), jnp.float32, -bound, bound)
        return w, b

    w1, b1 = lin(ks[0], ks[1], num_state, num_hidden)
    w2, b2 = lin(ks[2], ks[3], num_hidden, num_hidden)
    w3, b3 = lin(ks[4], ks[5], num_hidden, 1)
    return (w1, b1, w2, b2, w3, b3)


def reference_forward(x, params):
    w1, b1, w2, b2, w3, b3 = params
    h = jnp.maximum(x @ w1 + b1, 0.0)
    h = jnp.maximum(h @ w2 + b2, 0.0)
    return jax.nn.softplus(h @ w3 + b3)


if __name__ == "__main__":
    num_state, num_hidden = 16, 32

    key = jax.random.PRNGKey(0)
    k_x, k_x2, k_x3, k_p = jax.random.split(key, 4)
    params = init_params(k_p, num_state, num_hidden)

    # Small case, f32 matmul path: tight check against the f32 reference.
    x = jax.random.normal(k_x, (8, num_state), jnp.float32)
    out = jax.block_until_ready(w_forward(x, params, matmul_dtype=jnp.float32))
    ref = reference_forward(x, params)
    assert out.shape == (8, 1)
    assert jnp.allclose(out, ref, atol=5e-3, rtol=5e-3)

    # Ragged batch, default bf16 MXU operands: exercises padding + 2-step grid
    # (tm capped at 128 so grid=(2,)); looser tolerance for bf16 operands.
    x2 = jax.random.normal(k_x2, (200, num_state), jnp.float32)
    out2 = jax.block_until_ready(w_forward(x2, params))
    ref2 = reference_forward(x2, params)
    assert out2.shape == (200, 1)
    assert jnp.allclose(out2, ref2, atol=5e-2, rtol=5e-2)

    # Larger batch with the default block_m: grid>=2 via the megacore split.
    x3 = jax.random.normal(k_x3, (1000, num_state), jnp.float32)
    out3 = jax.block_until_ready(w_forward(x3, params))
    ref3 = reference_forward(x3, params)
    assert out3.shape == (1000, 1)
    assert jnp.allclose(out3, ref3, atol=5e-2, rtol=5e-2)

    print("KERNEL_OK")
</pallas_src>

<mosaic_0001>
module attributes {stable_mosaic.version = 11 : i64} {
  func.func @w_mlp_kernel(%arg0: i32, %arg1: memref<16x128xf32, #tpu.memory_space<vmem>>, %arg2: memref<32x16xf32, #tpu.memory_space<vmem>>, %arg3: memref<32x1xf32, #tpu.memory_space<vmem>>, %arg4: memref<32x32xf32, #tpu.memory_space<vmem>>, %arg5: memref<32x1xf32, #tpu.memory_space<vmem>>, %arg6: memref<1x32xf32, #tpu.memory_space<vmem>>, %arg7: memref<1x1xf32, #tpu.memory_space<vmem>>, %arg8: memref<1x128xf32, #tpu.memory_space<vmem>>) attributes {dimension_semantics = [#tpu.dimension_semantics<parallel>], iteration_bounds = array<i64: 1>, scalar_prefetch = 0 : i64, scratch_operands = 0 : i64, tpu.core_type = #tpu.core_type<tc>, window_params = [{transform_indices = @transform_0, window_bounds = array<i64: 16, 128>}, {pipeline_mode = #tpu.pipeline_mode<synchronous>, transform_indices = @transform_1, window_bounds = array<i64: 32, 16>}, {pipeline_mode = #tpu.pipeline_mode<synchronous>, transform_indices = @transform_2, window_bounds = array<i64: 32, 1>}, {pipeline_mode = #tpu.pipeline_mode<synchronous>, transform_indices = @transform_3, window_bounds = array<i64: 32, 32>}, {pipeline_mode = #tpu.pipeline_mode<synchronous>, transform_indices = @transform_4, window_bounds = array<i64: 32, 1>}, {pipeline_mode = #tpu.pipeline_mode<synchronous>, transform_indices = @transform_5, window_bounds = array<i64: 1, 32>}, {pipeline_mode = #tpu.pipeline_mode<synchronous>, transform_indices = @transform_6, window_bounds = array<i64: 1, 1>}, {transform_indices = @transform_7, window_bounds = array<i64: 1, 128>}]} {
    %c0 = arith.constant 0 : index
    %c0_0 = arith.constant 0 : index
    %0 = vector.load %arg2[%c0, %c0_0] : memref<32x16xf32, #tpu.memory_space<vmem>>, vector<32x16xf32>
    %c0_1 = arith.constant 0 : index
    %c0_2 = arith.constant 0 : index
    %1 = vector.load %arg4[%c0_1, %c0_2] : memref<32x32xf32, #tpu.memory_space<vmem>>, vector<32x32xf32>
    %c0_3 = arith.constant 0 : index
    %c0_4 = arith.constant 0 : index
    %2 = vector.load %arg6[%c0_3, %c0_4] : memref<1x32xf32, #tpu.memory_space<vmem>>, vector<1x32xf32>
    %c0_5 = arith.constant 0 : index
    %c0_6 = arith.constant 0 : index
    %3 = vector.load %arg1[%c0_5, %c0_6] : memref<16x128xf32, #tpu.memory_space<vmem>>, vector<16x128xf32>
    %cst = arith.constant dense<0.000000e+00> : vector<32x128xf32>
    %4 = tpu.matmul %0, %3, %cst {dimension_numbers = #tpu.dot_dimension_numbers<[1], [0], [0], [1], [0, 0, 1, 1], [], []>} : vector<32x16xf32>, vector<16x128xf32>, vector<32x128xf32> -> vector<32x128xf32>
    %c0_7 = arith.constant 0 : index
    %c0_8 = arith.constant 0 : index
    %5 = vector.load %arg3[%c0_7, %c0_8] : memref<32x1xf32, #tpu.memory_space<vmem>>, vector<32x1xf32>
    %6 = vector.broadcast %5 : vector<32x1xf32> to vector<32x128xf32>
    %7 = arith.addf %4, %6 : vector<32x128xf32>
    %cst_9 = arith.constant 0.000000e+00 : f32
    %8 = vector.broadcast %cst_9 : f32 to vector<32x128xf32>
    %9 = arith.maximumf %7, %8 : vector<32x128xf32>
    %cst_10 = arith.constant dense<0.000000e+00> : vector<32x128xf32>
    %10 = tpu.matmul %1, %9, %cst_10 {dimension_numbers = #tpu.dot_dimension_numbers<[1], [0], [0], [1], [0, 0, 1, 1], [], []>} : vector<32x32xf32>, vector<32x128xf32>, vector<32x128xf32> -> vector<32x128xf32>
    %c0_11 = arith.constant 0 : index
    %c0_12 = arith.constant 0 : index
    %11 = vector.load %arg5[%c0_11, %c0_12] : memref<32x1xf32, #tpu.memory_space<vmem>>, vector<32x1xf32>
    %12 = vector.broadcast %11 : vector<32x1xf32> to vector<32x128xf32>
    %13 = arith.addf %10, %12 : vector<32x128xf32>
    %cst_13 = arith.constant 0.000000e+00 : f32
    %14 = vector.broadcast %cst_13 : f32 to vector<32x128xf32>
    %15 = arith.maximumf %13, %14 : vector<32x128xf32>
    %cst_14 = arith.constant dense<0.000000e+00> : vector<1x128xf32>
    %16 = tpu.matmul %2, %15, %cst_14 {dimension_numbers = #tpu.dot_dimension_numbers<[1], [0], [0], [1], [0, 0, 1, 1], [], []>} : vector<1x32xf32>, vector<32x128xf32>, vector<1x128xf32> -> vector<1x128xf32>
    %c0_15 = arith.constant 0 : index
    %c0_16 = arith.constant 0 : index
    %17 = vector.load %arg7[%c0_15, %c0_16] : memref<1x1xf32, #tpu.memory_space<vmem>>, vector<1x1xf32>
    %18 = vector.broadcast %17 : vector<1x1xf32> to vector<1x128xf32>
    %19 = arith.addf %16, %18 : vector<1x128xf32>
    %cst_17 = arith.constant 2.000000e+01 : f32
    %20 = vector.broadcast %cst_17 : f32 to vector<1x128xf32>
    %21 = arith.cmpf ogt, %19, %20 : vector<1x128xf32>
    %cst_18 = arith.constant 2.000000e+01 : f32
    %22 = vector.broadcast %cst_18 : f32 to vector<1x128xf32>
    %23 = arith.minimumf %19, %22 : vector<1x128xf32>
    %24 = math.exp %23 : vector<1x128xf32>
    %25 = math.log1p %24 : vector<1x128xf32>
    %26 = arith.select %21, %19, %25 : vector<1x128xi1>, vector<1x128xf32>
    %c0_19 = arith.constant 0 : index
    %c0_20 = arith.constant 0 : index
    %27 = vector.load %arg8[%c0_19, %c0_20] : memref<1x128xf32, #tpu.memory_space<vmem>>, vector<1x128xf32>
    tpu.vector_store %arg8[%c0_19, %c0_20], %26 {strides = array<i32>} : memref<1x128xf32, #tpu.memory_space<vmem>>, vector<1x128xf32>,
    return
  }
  func.func @transform_0(%arg0: i32) -> (i32, i32) {
    %c0_i32 = arith.constant 0 : i32
    %c0_i32_0 = arith.constant 0 : i32
    return %c0_i32, %arg0 : i32, i32
  }
  func.func @transform_1(%arg0: i32) -> (i32, i32) {
    %c0_i32 = arith.constant 0 : i32
    %c0_i32_0 = arith.constant 0 : i32
    %c0_i32_1 = arith.constant 0 : i32
    return %c0_i32, %c0_i32_0 : i32, i32
  }
  func.func @transform_2(%arg0: i32) -> (i32, i32) {
    %c0_i32 = arith.constant 0 : i32
    %c0_i32_0 = arith.constant 0 : i32
    %c0_i32_1 = arith.constant 0 : i32
    return %c0_i32, %c0_i32_0 : i32, i32
  }
  func.func @transform_3(%arg0: i32) -> (i32, i32) {
    %c0_i32 = arith.constant 0 : i32
    %c0_i32_0 = arith.constant 0 : i32
    %c0_i32_1 = arith.constant 0 : i32
    return %c0_i32, %c0_i32_0 : i32, i32
  }
  func.func @transform_4(%arg0: i32) -> (i32, i32) {
    %c0_i32 = arith.constant 0 : i32
    %c0_i32_0 = arith.constant 0 : i32
    %c0_i32_1 = arith.constant 0 : i32
    return %c0_i32, %c0_i32_0 : i32, i32
  }
  func.func @transform_5(%arg0: i32) -> (i32, i32) {
    %c0_i32 = arith.constant 0 : i32
    %c0_i32_0 = arith.constant 0 : i32
    %c0_i32_1 = arith.constant 0 : i32
    return %c0_i32, %c0_i32_0 : i32, i32
  }
  func.func @transform_6(%arg0: i32) -> (i32, i32) {
    %c0_i32 = arith.constant 0 : i32
    %c0_i32_0 = arith.constant 0 : i32
    %c0_i32_1 = arith.constant 0 : i32
    return %c0_i32, %c0_i32_0 : i32, i32
  }
  func.func @transform_7(%arg0: i32) -> (i32, i32) {
    %c0_i32 = arith.constant 0 : i32
    %c0_i32_0 = arith.constant 0 : i32
    return %c0_i32, %arg0 : i32, i32
  }
}

</mosaic_0001>

<bundles_post_ra>
// kernel: tpu_custom_call.1
= control target key start
LH: loop header
LB: loop body
LE: loop exit
PB: predicated region body
PF: predicated region fallthrough
CT: control target
= control target key end

     0   :  { %s646_s0 = inlined_call_operand.vmem [shape: f32[16,128], index: 0, kind: input, shape index: {}]   ;;  %s647_s1 = inlined_call_operand.vmem [shape: f32[32,16], index: 1, kind: input, shape index: {}]   ;;  %s648_s2 = inlined_call_operand.vmem [shape: f32[32,1], index: 2, kind: input, shape index: {}]   ;;  %s649_s3 = inlined_call_operand.vmem [shape: f32[32,32], index: 3, kind: input, shape index: {}]   ;;  %s650_s4 = inlined_call_operand.vmem [shape: f32[32,1], index: 4, kind: input, shape index: {}]   ;;  %s651_s5 = inlined_call_operand.vmem [shape: f32[1,32], index: 5, kind: input, shape index: {}]   ;;  %s652_s6 = inlined_call_operand.<no memory space> [shape: f32[1,1], index: 6, kind: input, shape index: {}]   ;;  %s653_s7 = inlined_call_operand.hbm [shape: f32[1,128], index: 7, kind: output, shape index: {}]  }
   0x1   :  { %v12_v0 = vstv %s652_s6 }
   0x2   :  { %13 = vst [vmem:[#allocation2] sm:$0x1] %v12_v0 }
   0x3   :  { %v38_v1 = vld [vmem:[%s646_s0] sm:$0xff]  ;;  %v39_v2 = vld [vmem:[%s646_s0 + $0x8] sm:$0xff]  ;;  %vm64_vm0 = vcmask 130048   ;;  %v520_v5 = vmov 0   ;;  %v42_v7 = vld [vmem:[%s648_s2 + $0x10] sm:$0xff] }
   0x4   :  { %v29_v3 = vld [vmem:[%s647_s1] sm:$0xff]  ;;  %v467_v4 = vpack.c.bf16 %v39_v2, %v38_v1  ;;  %490 = vset.pattern.permute.xlu0 %v520_v5  ;;  %491 = vset.pattern.permute.xlu1 %v520_v5  ;;  %v30_v8 = vld [vmem:[%s647_s1 + $0x8] sm:$0xff]  ;;  %v31_v10 = vld [vmem:[%s647_s1 + $0x10] sm:$0xff] }
   0x5   :  { %436 = vmatprep.mubr.msk.f32.mxu0 %vm64_vm0, %v29_v3  ;;  %v40_v6 = vld [vmem:[%s648_s2] sm:$0xff]  ;;  %v41_v9 = vld [vmem:[%s648_s2 + $0x8] sm:$0xff]  ;;  %56 = vperm.xlu1 %491, %v42_v7   ;;  %v43_v11 = vld [vmem:[%s648_s2 + $0x18] sm:$0xff] }
   0x6   :  { %468 = vmatprep.subr.bf16.mxu0 %v467_v4  ;;  %46 = vperm.xlu0 %490, %v40_v6  }
   0x7   :  { %470 = vmatpush3.bf16.msra.mxu0 %v467_v4 }
   0x8   :  { %14 = vsyncpa [#allocation4], 0  ;;  %v32_v12 = vld [vmem:[%s647_s1 + $0x18] sm:$0xff]  ;;  %v166_v13 = vld [vmem:[%s650_s4] sm:$0xff]  ;;  %vm190_vm1 = vcmask 261120   ;;  %v521_v40 = vmov 0.0|0.0   ;;  %v298_v61 = vlaneseq }
   0x9   :  { %61 = vperm.xlu1 %491, %v43_v11   ;;  %v167_v14 = vld [vmem:[%s650_s4 + $0x8] sm:$0xff]  ;;  %v168_v15 = vld [vmem:[%s650_s4 + $0x10] sm:$0xff]  ;;  %v169_v16 = vld [vmem:[%s650_s4 + $0x18] sm:$0xff]  ;;  %479 = vmatprep.subr.bf16.mxu0 %v521_v40  ;;  %vm522_vm2 = vmmov 0   ;;  %v523_v41 = vmov 0.0  }
   0xa   :  { %437 = vmatmul.mubr.msk.f32.vlgmr.msra.gmra.mrb[0].mxu0 %vm64_vm0, %v30_v8  ;;  %51 = vperm.xlu0 %490, %v41_v9   ;;  %v292_v17 = vld [vmem:[#allocation2] sm:$0x1]  ;;  %v34_v37 = vld [vmem:[%s649_s3 + $0x8] sm:$0xff]  ;;  %v35_v38 = vld [vmem:[%s649_s3 + $0x10] sm:$0xff]  ;;  %v299_v62 = vshrl.u32 %v298_v61, 7 }
   0xb   :  { %439 = vmatprep.mubr.msk.f32.mxu0 %vm64_vm0, %v31_v10  ;;  %v33_v18 = vld [vmem:[%s649_s3] sm:$0xff]  ;;  %v36_v39 = vld [vmem:[%s649_s3 + $0x18] sm:$0xff] }
   0xc   :  { %450 = vmatprep.mubr.msk.f32.mxu1 %vm190_vm1, %v33_v18  ;;  %v37_v60 = vld [vmem:[%s651_s5] sm:$0x1]  ;;  %v300_v63 = vsub.s32 0, %v299_v62  ;;  %s524_s5 = smov [#allocation3]  }
   0xd   :  { %177 = vperm.xlu1 %491, %v167_v14   ;;  %s396_s11 = sshll.u32 %s524_s5, 4  ;;  %s397_s11 = int_to_ptr.vmem [resolvable:$true] %s396_s11 }
   0xe   :  { %440 = vmatmul.mubr.msk.f32.gmra.mrb[2].mxu0 %vm64_vm0, %v32_v12  ;;  %172 = vperm.xlu0 %490, %v166_v13   ;;  %s496_s0 = scalar_lea.vmem %s397_s11, 16  ;;  %s500_s12 = scalar_lea.vmem %s397_s11, 32 }
   0xf   :  { %464 = vmatprep.mubr.msk.f32.mxu0 %vm522_vm2, %v523_v41  ;;  %p497_p0 = scmp.ne.s32.totalorder %s397_s11, %s496_s0  ;;  %p501_p1 = scmp.lt.s32.totalorder %s397_s11, %s397_s11 }
  0x10   :  { %p502_p2 = scmp.lt.s32.totalorder %s500_s12, %s496_s0 }
  0x11   :  { %187 = vperm.xlu1 %491, %v169_v16  }
  0x12   :  { %182 = vperm.xlu0 %490, %v168_v15   ;;  %p503_p3 = por %p502_p2, %p501_p1 }
  0x14   :  { %p504_p4 = pnand %p503_p3, %p497_p0 }
  0x16   :  { %295 = vperm.xlu0 %490, %v292_v17  }
  0x84   :  { %v57_v20 = vpop.permute.xlu1 %56 }
  0x85   :  { %v47_v19 = vpop.permute.xlu0 %46 }
  0x88   :  { %v62_v27 = vpop.permute.xlu1 %61 }
  0x89   :  { %v52_v21 = vpop.permute.xlu0 %51 }
  0x8c   :  { %v178_v42 = vpop.permute.xlu1 %177 }
  0x8d   :  { %v173_v43 = vpop.permute.xlu0 %172 }
  0x90   :  { %v188_v49 = vpop.permute.xlu1 %187 }
  0x91   :  { %v183_v52 = vpop.permute.xlu0 %182 }
  0x95   :  { %v296_v0 = vpop.permute.xlu0 %295 }
  0x96   :  { %v301_v1 = vrot.slane %v296_v0, %v300_v63 }
  0xdd   :  { %v438_v22 = vpop.f32.mrb[0].mxu0 }
  0xde   :  { %v149_v23 = vadd.f32 %v438_v22, %v52_v21  ;;  %v143_v24 = vpop.f32.mrb[1].mxu0 }
  0xdf   :  { %v144_v25 = vadd.f32 %v143_v24, %v47_v19 }
  0xe0   :  { %v163_v26 = vmax.f32 %v149_v23, 0.0 }
  0xe1   :  { %v162_v28 = vmax.f32 %v144_v25, 0.0  ;;  %v441_v29 = vpop.f32.mrb[2].mxu0 }
  0xe2   :  { %v159_v30 = vadd.f32 %v441_v29, %v62_v27  ;;  %v153_v31 = vpop.f32.mrb[3].mxu0 }
  0xe3   :  { %v154_v32 = vadd.f32 %v153_v31, %v57_v20  ;;  %v471_v33 = vpack.c.bf16 %v163_v26, %v162_v28 }
  0xe4   :  { %v165_v34 = vmax.f32 %v159_v30, 0.0 }
  0xe5   :  { %v164_v35 = vmax.f32 %v154_v32, 0.0  ;;  %472 = vmatprep.subr.bf16.mxu1 %v471_v33 }
  0xe6   :  { %474 = vmatpush3.bf16.msra.mxu1 %v471_v33 }
  0xe7   :  { %v475_v36 = vpack.c.bf16 %v165_v34, %v164_v35 }
  0xe9   :  { %476 = vmatprep.subr.bf16.mxu1 %v475_v36 }
  0xea   :  { %478 = vmatpush3.bf16.msra.mxu1 %v475_v36 }
  0xed   :  { %451 = vmatmul.mubr.msk.f32.vlgmr.msra.gmra.mrb[0].mxu1 %vm190_vm1, %v34_v37 }
  0xee   :  { %453 = vmatprep.mubr.msk.f32.mxu1 %vm190_vm1, %v35_v38 }
  0xf1   :  { %454 = vmatmul.mubr.msk.f32.gmra.mrb[2].mxu1 %vm190_vm1, %v36_v39 }
 0x1c0   :  { %v452_v44 = vpop.f32.mrb[0].mxu1 }
 0x1c1   :  { %v275_v45 = vadd.f32 %v452_v44, %v178_v42  ;;  %v269_v46 = vpop.f32.mrb[1].mxu1 }
 0x1c2   :  { %v270_v47 = vadd.f32 %v269_v46, %v173_v43 }
 0x1c3   :  { %v289_v48 = vmax.f32 %v275_v45, 0.0 }
 0x1c4   :  { %v288_v50 = vmax.f32 %v270_v47, 0.0  ;;  %v455_v51 = vpop.f32.mrb[2].mxu1 }
 0x1c5   :  { %v285_v53 = vadd.f32 %v455_v51, %v188_v49  ;;  %v279_v54 = vpop.f32.mrb[3].mxu1 }
 0x1c6   :  { %v480_v55 = vpack.c.bf16 %v289_v48, %v288_v50  ;;  %v280_v56 = vadd.f32 %v279_v54, %v183_v52 }
 0x1c7   :  { %v291_v57 = vmax.f32 %v285_v53, 0.0 }
 0x1c8   :  { %v290_v58 = vmax.f32 %v280_v56, 0.0  ;;  %481 = vmatpush3.bf16.msra.mxu0 %v480_v55 }
 0x1c9   :  { %482 = vmatprep.subr.bf16.mxu0 %v521_v40 }
 0x1ca   :  { %v483_v59 = vpack.c.bf16 %v291_v57, %v290_v58 }
 0x1cc   :  { %484 = vmatpush3.bf16.msra.mxu0 %v483_v59 }
 0x1cf   :  { %465 = vmatmul.mubr.msk.f32.vlgmr.msra.gmra.mrb[4].mxu0 %vm190_vm1, %v37_v60 }
 0x2a2   :  { %v371_v2 = vpop.f32.mrb[4].mxu0 }
 0x2a3   :  { %v372_v3 = vadd.f32 %v371_v2, %v301_v1  ;;  %v466_v4 = vpop.f32.mrb[5].mxu0 }
 0x2a5   :  { %v376_v5 = vmin.f32 %v372_v3, 20.0  ;;  %vm375_vm4 = vcmp.gt.f32.partialorder %v372_v3, 20.0 }
 0x2a7   :  { %v377_v6 = vmul.f32 1.442695, %v376_v5 }
 0x2a9   :  { %492 = vpow2.f32 %v377_v6 }
 0x2b3   :  { %v493_v7 = vpop.eup %492 }
 0x2b4   :  { %v379_v8 = vadd.f32 1.0, %v493_v7  ;;  %v382_v9 = vmul.f32 -0.5, %v493_v7  ;;  %v385_v11 = vand.u32 2147483647, %v493_v7 }
 0x2b6   :  { %494 = vlog2.f32 %v379_v8  ;;  %v383_v10 = vadd.f32 1.0, %v382_v9  ;;  %vm386_vm3 = vcmp.lt.f32.partialorder %v385_v11, 0.0004427343 }
 0x2b8   :  { %v384_v14 = vmul.f32 %v493_v7, %v383_v10 }
 0x2c0   :  { %v495_v12 = vpop.eup %494 }
 0x2c1   :  { %v381_v13 = vmul.f32 0.6931472, %v495_v12 }
 0x2c3   :  { %v387_v15 = vsel %vm386_vm3, %v384_v14, %v381_v13 }
 0x2c4   :  { %v388_v16 = vsel %vm375_vm4, %v372_v3, %v387_v15 }
 0x2c5   :  { %389 = vst [vmem:[#allocation3] sm:$0x1] %v388_v16 }
 0x2c6   :  { %507 = shalt.err (!%p504_p4)
}
 0x2c7   :  { %s508_s15 = scalar_lea.hbm %s653_s7, 16 }
 0x2c8   :  { %p509_p5 = scmp.ne.s32.totalorder %s653_s7, %s508_s15  ;;  %p512_p6 = scmp.lt.u32.totalorder %s508_s15, %s653_s7 }
 0x2ca   :  { %p514_p7 = pnand %p512_p6, %p509_p5 }
 0x2cc   :  { %517 = shalt.err (!%p514_p7)
}
 0x2cd   :  { %399 = dma.vmem_to_hbm [thread:$0]  %s397_s11, 16, %s653_s7, [#allocation4]  }
 0x2ce   :  { %518 = dma.done.wait [#allocation4], 16  }
 0x2cf   :  { %519 = vsyncadd [#allocation4], 4294967280 }
 0x2d0   :  { %403 = vsyncpa [#allocation4], 1 }

</bundles_post_ra>
